<compile_context>
chip_gen: v5e
topology: v5e:2x2
jax: 0.10.0
libtpu: 0.0.40
codegen_flags: <defaults>
</compile_context>

<pallas_src>
import functools

import jax
import jax.numpy as jnp
from jax import lax
from jax.experimental import pallas as pl
from jax.experimental.pallas import tpu as pltpu

LANE = 128


def _round_up(x, m):
    return (x + m - 1) // m * m


def mlp_kernel(x_ref, w_in_ref, b_in_ref, w_hid_ref, b_hid_ref,
               w_out_ref, b_out_ref, out_ref, *, depth):
    cdt = w_in_ref.dtype  # matmul compute dtype (f32 or bf16)

    # linearIn + tanh (MXU accumulates in f32; elementwise stays f32 for v5e)
    h = jnp.tanh(
        jnp.dot(x_ref[...], w_in_ref[...], preferred_element_type=jnp.float32)
        + b_in_ref[...]
    )

    # depth hidden layers: dynamic index into the resident weight stack
    def body(d, h):
        return jnp.tanh(
            jnp.dot(h.astype(cdt), w_hid_ref[d],
                    preferred_element_type=jnp.float32)
            + b_hid_ref[d]
        )

    h = lax.fori_loop(0, depth, body, h)

    # linearOut (no activation)
    out_ref[...] = (
        jnp.dot(h.astype(cdt), w_out_ref[...],
                preferred_element_type=jnp.float32)
        + b_out_ref[...]
    ).astype(out_ref.dtype)


@functools.partial(jax.jit, static_argnames=("depth", "matmul_dtype", "tile_m"))
def mlp_forward(x, params, depth, *, matmul_dtype=jnp.float32, tile_m=256):
    """x: [batch, in_dims] f32. params as produced by init_params (unpadded)."""
    w_in, b_in, w_hid, b_hid, w_out, b_out = params
    batch, in_dims = x.shape
    middle_dims = w_in.shape[1]
    out_dims = w_out.shape[1]

    # lane padding (feature dims -> multiples of 128)
    in_p = _round_up(in_dims, LANE)
    mid_p = _round_up(middle_dims, LANE)
    out_p = _round_up(out_dims, LANE)

    # batch tiling (tile must be a multiple of 8 sublanes)
    tm = min(tile_m, _round_up(batch, 8))
    batch_p = _round_up(batch, tm)

    # zero-pad everything; padded lanes stay zero through the tanh layers
    xp = jnp.pad(x, ((0, batch_p - batch), (0, in_p - in_dims))).astype(matmul_dtype)
    w_in_p = jnp.pad(w_in, ((0, in_p - in_dims), (0, mid_p - middle_dims))).astype(matmul_dtype)
    b_in_p = jnp.pad(b_in, ((0, 0), (0, mid_p - middle_dims)))
    w_hid_p = jnp.pad(
        w_hid, ((0, 0), (0, mid_p - middle_dims), (0, mid_p - middle_dims))
    ).astype(matmul_dtype)
    b_hid_p = jnp.pad(b_hid, ((0, 0), (0, 0), (0, mid_p - middle_dims)))
    w_out_p = jnp.pad(w_out, ((0, mid_p - middle_dims), (0, out_p - out_dims))).astype(matmul_dtype)
    b_out_p = jnp.pad(b_out, ((0, 0), (0, out_p - out_dims)))

    grid = (batch_p // tm,)
    kernel = functools.partial(mlp_kernel, depth=depth)

    # rough VMEM budget: resident weights (double-buffered by the pipeline) +
    # pipelined activation tiles + loop-live hidden activations
    wi = jnp.dtype(matmul_dtype).itemsize
    w_bytes = (in_p * mid_p + depth * mid_p * mid_p + mid_p * out_p) * wi
    b_bytes = ((depth + 1) * mid_p + out_p) * 4
    act_bytes = 2 * tm * (in_p * wi + out_p * 4) + 4 * tm * mid_p * 4
    vmem_limit = int(min(max(2 * (w_bytes + b_bytes) + act_bytes,
                             32 * 1024 * 1024), 64 * 1024 * 1024))
    # TODO(synk): for very large depth*mid_p^2 (>~ VMEM), keep only two hidden
    # layers resident and manually prefetch layer d+1 with make_async_copy
    # instead of keeping the whole hidden-weight stack in VMEM.

    out_padded = pl.pallas_call(
        kernel,
        out_shape=jax.ShapeDtypeStruct((batch_p, out_p), jnp.float32),
        grid_spec=pltpu.PrefetchScalarGridSpec(
            num_scalar_prefetch=0,
            grid=grid,
            in_specs=[
                pl.BlockSpec((tm, in_p), lambda i: (i, 0)),                # x tile
                pl.BlockSpec((in_p, mid_p), lambda i: (0, 0)),             # w_in (resident)
                pl.BlockSpec((1, mid_p), lambda i: (0, 0)),                # b_in
                pl.BlockSpec((depth, mid_p, mid_p), lambda i: (0, 0, 0)),  # w_hid stack
                pl.BlockSpec((depth, 1, mid_p), lambda i: (0, 0, 0)),      # b_hid stack
                pl.BlockSpec((mid_p, out_p), lambda i: (0, 0)),            # w_out
                pl.BlockSpec((1, out_p), lambda i: (0, 0)),                # b_out
            ],
            out_specs=pl.BlockSpec((tm, out_p), lambda i: (i, 0)),
        ),
        compiler_params=pltpu.CompilerParams(
            dimension_semantics=("parallel",),   # shard batch tiles across TCs (v7x)
            vmem_limit_bytes=vmem_limit,
        ),
    )(xp, w_in_p, b_in_p, w_hid_p, b_hid_p, w_out_p, b_out_p)

    return out_padded[:batch, :out_dims]


def xavier_normal(key, fan_in, fan_out):
    std = (2.0 / (fan_in + fan_out)) ** 0.5
    # stored as [fan_in, fan_out] (transpose of PyTorch nn.Linear.weight)
    return std * jax.random.normal(key, (fan_in, fan_out), dtype=jnp.float32)


def init_params(key, in_dims, middle_dims, out_dims, depth):
    keys = jax.random.split(key, depth + 2)
    w_in = xavier_normal(keys[0], in_dims, middle_dims)
    b_in = jnp.zeros((1, middle_dims), jnp.float32)
    w_hid = jnp.stack(
        [xavier_normal(keys[1 + d], middle_dims, middle_dims) for d in range(depth)]
    )  # [depth, middle, middle]
    b_hid = jnp.zeros((depth, 1, middle_dims), jnp.float32)
    w_out = xavier_normal(keys[depth + 1], middle_dims, out_dims)
    b_out = jnp.zeros((1, out_dims), jnp.float32)
    return w_in, b_in, w_hid, b_hid, w_out, b_out


def reference_forward(x, params, depth):
    w_in, b_in, w_hid, b_hid, w_out, b_out = params
    h = jnp.tanh(x @ w_in + b_in)
    for d in range(depth):
        h = jnp.tanh(h @ w_hid[d] + b_hid[d])
    return h @ w_out + b_out


if __name__ == "__main__":
    in_dims, middle_dims, out_dims, depth = 16, 32, 8, 3
    batch = 8

    key = jax.random.PRNGKey(0)
    kx, kp = jax.random.split(key)
    x = jax.random.normal(kx, (batch, in_dims), dtype=jnp.float32)
    params = init_params(kp, in_dims, middle_dims, out_dims, depth)

    ref = reference_forward(x, params, depth)

    # f32 matmul path (bit-faithful to the PyTorch module)
    out = jax.block_until_ready(mlp_forward(x, params, depth,
                                            matmul_dtype=jnp.float32))
    assert out.shape == (batch, out_dims)
    assert jnp.allclose(out, ref, atol=1e-5, rtol=1e-5)

    # bf16 matmul path (production path for v6e/v7x MXU), f32 accumulation
    out_bf16 = jax.block_until_ready(mlp_forward(x, params, depth,
                                                 matmul_dtype=jnp.bfloat16))
    assert out_bf16.shape == (batch, out_dims)
    assert jnp.allclose(out_bf16, ref, atol=1e-1, rtol=1e-1)

    print("KERNEL_OK")
</pallas_src>

<mosaic_0001>
module attributes {stable_mosaic.version = 11 : i64} {
  func.func @mlp_kernel(%arg0: i32, %arg1: memref<8x128xf32, #tpu.memory_space<vmem>>, %arg2: memref<128x128xf32, #tpu.memory_space<vmem>>, %arg3: memref<1x128xf32, #tpu.memory_space<vmem>>, %arg4: memref<3x128x128xf32, #tpu.memory_space<vmem>>, %arg5: memref<3x1x128xf32, #tpu.memory_space<vmem>>, %arg6: memref<128x128xf32, #tpu.memory_space<vmem>>, %arg7: memref<1x128xf32, #tpu.memory_space<vmem>>, %arg8: memref<8x128xf32, #tpu.memory_space<vmem>>) attributes {dimension_semantics = [#tpu.dimension_semantics<parallel>], iteration_bounds = array<i64: 1>, scalar_prefetch = 0 : i64, scratch_operands = 0 : i64, tpu.core_type = #tpu.core_type<tc>, window_params = [{transform_indices = @transform_0, window_bounds = array<i64: 8, 128>}, {pipeline_mode = #tpu.pipeline_mode<synchronous>, transform_indices = @transform_1, window_bounds = array<i64: 128, 128>}, {pipeline_mode = #tpu.pipeline_mode<synchronous>, transform_indices = @transform_2, window_bounds = array<i64: 1, 128>}, {pipeline_mode = #tpu.pipeline_mode<synchronous>, transform_indices = @transform_3, window_bounds = array<i64: 3, 128, 128>}, {pipeline_mode = #tpu.pipeline_mode<synchronous>, transform_indices = @transform_4, window_bounds = array<i64: 3, 1, 128>}, {pipeline_mode = #tpu.pipeline_mode<synchronous>, transform_indices = @transform_5, window_bounds = array<i64: 128, 128>}, {pipeline_mode = #tpu.pipeline_mode<synchronous>, transform_indices = @transform_6, window_bounds = array<i64: 1, 128>}, {transform_indices = @transform_7, window_bounds = array<i64: 8, 128>}]} {
    %c0 = arith.constant 0 : index
    %c0_0 = arith.constant 0 : index
    %0 = vector.load %arg1[%c0, %c0_0] : memref<8x128xf32, #tpu.memory_space<vmem>>, vector<8x128xf32>
    %c0_1 = arith.constant 0 : index
    %c0_2 = arith.constant 0 : index
    %1 = vector.load %arg2[%c0_1, %c0_2] : memref<128x128xf32, #tpu.memory_space<vmem>>, vector<128x128xf32>
    %cst = arith.constant dense<0.000000e+00> : vector<8x128xf32>
    %2 = tpu.matmul %0, %1, %cst {dimension_numbers = #tpu.dot_dimension_numbers<[1], [0], [0], [1], [0, 0, 1, 1], [], []>} : vector<8x128xf32>, vector<128x128xf32>, vector<8x128xf32> -> vector<8x128xf32>
    %c0_3 = arith.constant 0 : index
    %c0_4 = arith.constant 0 : index
    %3 = vector.load %arg3[%c0_3, %c0_4] : memref<1x128xf32, #tpu.memory_space<vmem>>, vector<1x128xf32>
    %4 = vector.broadcast %3 : vector<1x128xf32> to vector<8x128xf32>
    %5 = arith.addf %2, %4 : vector<8x128xf32>
    %6 = math.tanh %5 : vector<8x128xf32>
    %c0_i32 = arith.constant 0 : i32
    %c3_i32 = arith.constant 3 : i32
    %7 = arith.addi %c0_i32, %c3_i32 : i32
    %c1_i32 = arith.constant 1 : i32
    %8 = scf.for %arg9 = %c0_i32 to %7 step %c1_i32 iter_args(%arg10 = %6) -> (vector<8x128xf32>)  : i32 {
      %15 = arith.index_cast %arg9 : i32 to index
      %c0_13 = arith.constant 0 : index
      %c0_14 = arith.constant 0 : index
      %16 = vector.load %arg4[%15, %c0_13, %c0_14] : memref<3x128x128xf32, #tpu.memory_space<vmem>>, vector<1x128x128xf32>
      %17 = vector.shape_cast %16 : vector<1x128x128xf32> to vector<128x128xf32>
      %cst_15 = arith.constant dense<0.000000e+00> : vector<8x128xf32>
      %18 = tpu.matmul %arg10, %17, %cst_15 {dimension_numbers = #tpu.dot_dimension_numbers<[1], [0], [0], [1], [0, 0, 1, 1], [], []>} : vector<8x128xf32>, vector<128x128xf32>, vector<8x128xf32> -> vector<8x128xf32>
      %19 = arith.index_cast %arg9 : i32 to index
      %c0_16 = arith.constant 0 : index
      %c0_17 = arith.constant 0 : index
      %20 = vector.load %arg5[%19, %c0_16, %c0_17] : memref<3x1x128xf32, #tpu.memory_space<vmem>>, vector<1x1x128xf32>
      %21 = vector.shape_cast %20 : vector<1x1x128xf32> to vector<1x128xf32>
      %22 = vector.broadcast %21 : vector<1x128xf32> to vector<8x128xf32>
      %23 = arith.addf %18, %22 : vector<8x128xf32>
      %24 = math.tanh %23 : vector<8x128xf32>
      scf.yield %24 : vector<8x128xf32>
    }
    %c3_i32_5 = arith.constant 3 : i32
    %c0_6 = arith.constant 0 : index
    %c0_7 = arith.constant 0 : index
    %9 = vector.load %arg6[%c0_6, %c0_7] : memref<128x128xf32, #tpu.memory_space<vmem>>, vector<128x128xf32>
    %cst_8 = arith.constant dense<0.000000e+00> : vector<8x128xf32>
    %10 = tpu.matmul %8, %9, %cst_8 {dimension_numbers = #tpu.dot_dimension_numbers<[1], [0], [0], [1], [0, 0, 1, 1], [], []>} : vector<8x128xf32>, vector<128x128xf32>, vector<8x128xf32> -> vector<8x128xf32>
    %c0_9 = arith.constant 0 : index
    %c0_10 = arith.constant 0 : index
    %11 = vector.load %arg7[%c0_9, %c0_10] : memref<1x128xf32, #tpu.memory_space<vmem>>, vector<1x128xf32>
    %12 = vector.broadcast %11 : vector<1x128xf32> to vector<8x128xf32>
    %13 = arith.addf %10, %12 : vector<8x128xf32>
    %c0_11 = arith.constant 0 : index
    %c0_12 = arith.constant 0 : index
    %14 = vector.load %arg8[%c0_11, %c0_12] : memref<8x128xf32, #tpu.memory_space<vmem>>, vector<8x128xf32>
    tpu.vector_store %arg8[%c0_11, %c0_12], %13 {strides = array<i32>} : memref<8x128xf32, #tpu.memory_space<vmem>>, vector<8x128xf32>,
    return
  }
  func.func @transform_0(%arg0: i32) -> (i32, i32) {
    %c0_i32 = arith.constant 0 : i32
    %c0_i32_0 = arith.constant 0 : i32
    return %arg0, %c0_i32 : i32, i32
  }
  func.func @transform_1(%arg0: i32) -> (i32, i32) {
    %c0_i32 = arith.constant 0 : i32
    %c0_i32_0 = arith.constant 0 : i32
    %c0_i32_1 = arith.constant 0 : i32
    return %c0_i32, %c0_i32_0 : i32, i32
  }
  func.func @transform_2(%arg0: i32) -> (i32, i32) {
    %c0_i32 = arith.constant 0 : i32
    %c0_i32_0 = arith.constant 0 : i32
    %c0_i32_1 = arith.constant 0 : i32
    return %c0_i32, %c0_i32_0 : i32, i32
  }
  func.func @transform_3(%arg0: i32) -> (i32, i32, i32) {
    %c0_i32 = arith.constant 0 : i32
    %c0_i32_0 = arith.constant 0 : i32
    %c0_i32_1 = arith.constant 0 : i32
    %c0_i32_2 = arith.constant 0 : i32
    return %c0_i32, %c0_i32_0, %c0_i32_1 : i32, i32, i32
  }
  func.func @transform_4(%arg0: i32) -> (i32, i32, i32) {
    %c0_i32 = arith.constant 0 : i32
    %c0_i32_0 = arith.constant 0 : i32
    %c0_i32_1 = arith.constant 0 : i32
    %c0_i32_2 = arith.constant 0 : i32
    return %c0_i32, %c0_i32_0, %c0_i32_1 : i32, i32, i32
  }
  func.func @transform_5(%arg0: i32) -> (i32, i32) {
    %c0_i32 = arith.constant 0 : i32
    %c0_i32_0 = arith.constant 0 : i32
    %c0_i32_1 = arith.constant 0 : i32
    return %c0_i32, %c0_i32_0 : i32, i32
  }
  func.func @transform_6(%arg0: i32) -> (i32, i32) {
    %c0_i32 = arith.constant 0 : i32
    %c0_i32_0 = arith.constant 0 : i32
    %c0_i32_1 = arith.constant 0 : i32
    return %c0_i32, %c0_i32_0 : i32, i32
  }
  func.func @transform_7(%arg0: i32) -> (i32, i32) {
    %c0_i32 = arith.constant 0 : i32
    %c0_i32_0 = arith.constant 0 : i32
    return %arg0, %c0_i32 : i32, i32
  }
}

</mosaic_0001>

<bundles_post_ra>
// kernel: mlp_forward.1
= control target key start
LH: loop header
LB: loop body
LE: loop exit
PB: predicated region body
PF: predicated region fallthrough
CT: control target
= control target key end

     0   :  { %12 = vsyncpa [#allocation3], 0  ;;  %s350_s14 = smov 0   ;;  %s425_s0 = inlined_call_operand.vmem [shape: f32[8,128], index: 0, kind: input, shape index: {}]   ;;  %s426_s1 = inlined_call_operand.vmem [shape: f32[128,128], index: 1, kind: input, shape index: {}]   ;;  %s427_s2 = inlined_call_operand.vmem [shape: f32[1,128], index: 2, kind: input, shape index: {}]   ;;  %s428_s3 = inlined_call_operand.vmem [shape: f32[3,128,128], index: 3, kind: input, shape index: {}]   ;;  %s429_s4 = inlined_call_operand.vmem [shape: f32[3,1,128], index: 4, kind: input, shape index: {}]   ;;  %s430_s5 = inlined_call_operand.vmem [shape: f32[128,128], index: 5, kind: input, shape index: {}]   ;;  %s431_s6 = inlined_call_operand.vmem [shape: f32[1,128], index: 6, kind: input, shape index: {}]   ;;  %s432_s7 = inlined_call_operand.hbm [shape: f32[8,128], index: 7, kind: output, shape index: {}]  }
   0x1   :  { %v43_v0 = vld [vmem:[%s426_s1 + $0x78] sm:$0xff]  ;;  %v42_v1 = vld [vmem:[%s426_s1 + $0x70] sm:$0xff]  ;;  %v41_v2 = vld [vmem:[%s426_s1 + $0x68] sm:$0xff] }
   0x2   :  { %48 = vmatpush.msra.mxu0 %v43_v0  ;;  %v40_v3 = vld [vmem:[%s426_s1 + $0x60] sm:$0xff]  ;;  %v39_v4 = vld [vmem:[%s426_s1 + $0x58] sm:$0xff]  ;;  %v38_v5 = vld [vmem:[%s426_s1 + $0x50] sm:$0xff] }
   0x3   :  { %v37_v6 = vld [vmem:[%s426_s1 + $0x48] sm:$0xff]  ;;  %v36_v7 = vld [vmem:[%s426_s1 + $0x40] sm:$0xff]  ;;  %v35_v8 = vld [vmem:[%s426_s1 + $0x38] sm:$0xff] }
   0x4   :  { %49 = vmatpush.msra.mxu0 %v42_v1  ;;  %v34_v9 = vld [vmem:[%s426_s1 + $0x30] sm:$0xff]  ;;  %v33_v10 = vld [vmem:[%s426_s1 + $0x28] sm:$0xff]  ;;  %v32_v11 = vld [vmem:[%s426_s1 + $0x20] sm:$0xff] }
   0x5   :  { %v31_v12 = vld [vmem:[%s426_s1 + $0x18] sm:$0xff]  ;;  %v30_v13 = vld [vmem:[%s426_s1 + $0x10] sm:$0xff]  ;;  %v29_v14 = vld [vmem:[%s426_s1 + $0x8] sm:$0xff] }
   0x6   :  { %50 = vmatpush.msra.mxu0 %v41_v2  ;;  %v28_v15 = vld [vmem:[%s426_s1] sm:$0xff] }
   0x7   :  { %v27_v16 = vld [vmem:[%s425_s0] sm:$0xff] }
   0x8   :  { %51 = vmatpush.msra.mxu0 %v40_v3  ;;  %v206_v17 = vld [vmem:[%s427_s2] ss:$0 sm:$0xff] }
   0xa   :  { %52 = vmatpush.msra.mxu0 %v39_v4 }
   0xc   :  { %53 = vmatpush.msra.mxu0 %v38_v5 }
   0xe   :  { %54 = vmatpush.msra.mxu0 %v37_v6 }
  0x10   :  { %55 = vmatpush.msra.mxu0 %v36_v7 }
  0x12   :  { %56 = vmatpush.msra.mxu0 %v35_v8 }
  0x14   :  { %57 = vmatpush.msra.mxu0 %v34_v9 }
  0x16   :  { %58 = vmatpush.msra.mxu0 %v33_v10 }
  0x18   :  { %59 = vmatpush.msra.mxu0 %v32_v11 }
  0x1a   :  { %60 = vmatpush.msra.mxu0 %v31_v12 }
  0x1c   :  { %61 = vmatpush.msra.mxu0 %v30_v13 }
  0x1e   :  { %62 = vmatpush.msra.mxu0 %v29_v14 }
  0x20   :  { %63 = vmatpush.msra.mxu0 %v28_v15 }
  0x21   :  { %64 = vmatmul.f32.vlgmr.msra.gmra.mxu0 %v27_v16 }
  0x9e   :  { %v65_v18 = vpop.f32.mrf.mxu0 }
  0x9f   :  { %v66_v19 = vadd.f32 %v206_v17, %v65_v18 }
  0xa1   :  { %207 = vtanh.f32 %v66_v19 }
  0xa7   :  { %v208_v20 = vpop.eup %207  }
  0xa8   :  { %v247_v21 = vmov %v208_v20  }
  0xa9 LB: > { %s188_s0 = sshll.u32 %s253_s14, 7  ;;  %s94_s2 = scalar_lea.vmem %s429_s4, %s253_s14  ;;  %s253_s14 = sphi %s350_s14, %s74_s14   ;;  %v249_v21 = vphi %v247_v21, %v248_v21  }
  0xaa   : > { %s77_s18 = scalar_lea.vmem %s428_s3, %s188_s0  ;;  %v209_v38 = vld [vmem:[%s94_s2] ss:$0 sm:$0xff]  ;;  %s74_s14 = sadd.s32 1, %s253_s14  }
  0xab   : > { %v93_v22 = vld [vmem:[%s77_s18 + $0x78] sm:$0xff]  ;;  %v92_v23 = vld [vmem:[%s77_s18 + $0x70] sm:$0xff]  ;;  %v91_v24 = vld [vmem:[%s77_s18 + $0x68] sm:$0xff]  ;;  %p71_p0 = scmp.ge.s32.totalorder %s74_s14, 3  }
  0xac   : > { %99 = vmatpush.msra.mxu0 %v93_v22  ;;  %v90_v25 = vld [vmem:[%s77_s18 + $0x60] sm:$0xff]  ;;  %v89_v26 = vld [vmem:[%s77_s18 + $0x58] sm:$0xff]  ;;  %v88_v27 = vld [vmem:[%s77_s18 + $0x50] sm:$0xff]  ;;  %s255_s27 = smov (%p71_p0), [#allocation2]   ;;  %s168_s4 = sshll.u32 (%p71_p0), %s432_s7, 4  ;;  %s169_s4 = int_to_ptr.hbm [resolvable:$true] %s168_s4 }
  0xad   : > { %v87_v28 = vld [vmem:[%s77_s18 + $0x48] sm:$0xff]  ;;  %v86_v29 = vld [vmem:[%s77_s18 + $0x40] sm:$0xff]  ;;  %v85_v30 = vld [vmem:[%s77_s18 + $0x38] sm:$0xff]  ;;  %s166_s28 = sshll.u32 (%p71_p0), %s255_s27, 4  ;;  %s167_s28 = int_to_ptr.vmem [resolvable:$true] %s166_s28 }
  0xae   : > { %100 = vmatpush.msra.mxu0 %v92_v23  ;;  %v84_v31 = vld [vmem:[%s77_s18 + $0x30] sm:$0xff]  ;;  %v83_v32 = vld [vmem:[%s77_s18 + $0x28] sm:$0xff]  ;;  %v82_v33 = vld [vmem:[%s77_s18 + $0x20] sm:$0xff] }
  0xaf   : > { %v81_v34 = vld [vmem:[%s77_s18 + $0x18] sm:$0xff]  ;;  %v80_v35 = vld [vmem:[%s77_s18 + $0x10] sm:$0xff]  ;;  %v79_v36 = vld [vmem:[%s77_s18 + $0x8] sm:$0xff] }
  0xb0   : > { %101 = vmatpush.msra.mxu0 %v91_v24  ;;  %v78_v37 = vld [vmem:[%s77_s18] sm:$0xff]  ;;  %v135_v42 = vld [vmem:[%s430_s5 + $0x78] sm:$0xff] (%p71_p0)  ;;  %v134_v43 = vld [vmem:[%s430_s5 + $0x70] sm:$0xff] (%p71_p0) }
  0xb1   :  { %v133_v44 = vld [vmem:[%s430_s5 + $0x68] sm:$0xff] (%p71_p0)  ;;  %v132_v45 = vld [vmem:[%s430_s5 + $0x60] sm:$0xff] (%p71_p0)  ;;  %v131_v46 = vld [vmem:[%s430_s5 + $0x58] sm:$0xff] (%p71_p0) }
  0xb2   : > { %102 = vmatpush.msra.mxu0 %v90_v25  ;;  %v130_v47 = vld [vmem:[%s430_s5 + $0x50] sm:$0xff] (%p71_p0)  ;;  %v129_v48 = vld [vmem:[%s430_s5 + $0x48] sm:$0xff] (%p71_p0)  ;;  %v128_v49 = vld [vmem:[%s430_s5 + $0x40] sm:$0xff] (%p71_p0) }
  0xb3   :  { %v127_v50 = vld [vmem:[%s430_s5 + $0x38] sm:$0xff] (%p71_p0)  ;;  %v126_v51 = vld [vmem:[%s430_s5 + $0x30] sm:$0xff] (%p71_p0)  ;;  %v125_v52 = vld [vmem:[%s430_s5 + $0x28] sm:$0xff] (%p71_p0) }
  0xb4   : > { %103 = vmatpush.msra.mxu0 %v89_v26  ;;  %v124_v53 = vld [vmem:[%s430_s5 + $0x20] sm:$0xff] (%p71_p0)  ;;  %v123_v54 = vld [vmem:[%s430_s5 + $0x18] sm:$0xff] (%p71_p0)  ;;  %v122_v55 = vld [vmem:[%s430_s5 + $0x10] sm:$0xff] (%p71_p0) }
  0xb5   :  { %v121_v56 = vld [vmem:[%s430_s5 + $0x8] sm:$0xff] (%p71_p0)  ;;  %v120_v57 = vld [vmem:[%s430_s5] sm:$0xff] (%p71_p0) }
  0xb6   : > { %104 = vmatpush.msra.mxu0 %v88_v27  ;;  %v212_v58 = vld [vmem:[%s431_s6] ss:$0 sm:$0xff] (%p71_p0) }
  0xb8   : > { %105 = vmatpush.msra.mxu0 %v87_v28 }
  0xba   : > { %106 = vmatpush.msra.mxu0 %v86_v29 }
  0xbc   : > { %107 = vmatpush.msra.mxu0 %v85_v30 }
  0xbe   : > { %108 = vmatpush.msra.mxu0 %v84_v31 }
  0xc0   : > { %109 = vmatpush.msra.mxu0 %v83_v32 }
  0xc2   : > { %110 = vmatpush.msra.mxu0 %v82_v33 }
  0xc4   : > { %111 = vmatpush.msra.mxu0 %v81_v34 }
  0xc6   : > { %112 = vmatpush.msra.mxu0 %v80_v35 }
  0xc8   : > { %113 = vmatpush.msra.mxu0 %v79_v36 }
  0xca   : > { %114 = vmatpush.msra.mxu0 %v78_v37 }
  0xcb   : > { %115 = vmatmul.f32.vlgmr.msra.gmra.mxu0 %v249_v21 }
  0xcc   :  { %140 = vmatpush.msra.mxu0 (%p71_p0), %v135_v42 }
  0xce   :  { %141 = vmatpush.msra.mxu0 (%p71_p0), %v134_v43 }
  0xd0   :  { %142 = vmatpush.msra.mxu0 (%p71_p0), %v133_v44 }
  0xd2   :  { %143 = vmatpush.msra.mxu0 (%p71_p0), %v132_v45 }
  0xd4   :  { %144 = vmatpush.msra.mxu0 (%p71_p0), %v131_v46 }
  0xd6   :  { %145 = vmatpush.msra.mxu0 (%p71_p0), %v130_v47 }
  0xd8   :  { %146 = vmatpush.msra.mxu0 (%p71_p0), %v129_v48 }
  0xda   :  { %147 = vmatpush.msra.mxu0 (%p71_p0), %v128_v49 }
  0xdc   :  { %148 = vmatpush.msra.mxu0 (%p71_p0), %v127_v50 }
  0xde   :  { %149 = vmatpush.msra.mxu0 (%p71_p0), %v126_v51 }
  0xe0   :  { %150 = vmatpush.msra.mxu0 (%p71_p0), %v125_v52 }
  0xe2   :  { %151 = vmatpush.msra.mxu0 (%p71_p0), %v124_v53 }
  0xe4   :  { %152 = vmatpush.msra.mxu0 (%p71_p0), %v123_v54 }
  0xe6   :  { %153 = vmatpush.msra.mxu0 (%p71_p0), %v122_v55 }
  0xe8   :  { %154 = vmatpush.msra.mxu0 (%p71_p0), %v121_v56 }
  0xea   :  { %155 = vmatpush.msra.mxu0 (%p71_p0), %v120_v57 }
 0x148   : > { %v116_v39 = vpop.f32.mrf.mxu0 }
 0x149   : > { %v117_v40 = vadd.f32 %v209_v38, %v116_v39 }
 0x14b   : > { %210 = vtanh.f32 %v117_v40 }
 0x14e   :  { %73 = sbr.rel (!%p71_p0) target bundleno = 169 (0xa9), region = 57 }
 0x151   : > { %v211_v41 = vpop.eup %210  }
 0x152   : > { %v248_v21 = vmov %v211_v41   ;;  %156 = vmatmul.f32.vlgmr.msra.gmra.mxu0 (%p71_p0), %v211_v41 }
 0x1cf   :  { %v157_v59 = vpop.f32.mrf.mxu0 }
 0x1d0   :  { %v158_v60 = vadd.f32 %v212_v58, %v157_v59 }
 0x1d2   :  { %160 = vst [vmem:[#allocation2] sm:$0xff] %v158_v60 }
 0x1d3   :  { %171 = dma.vmem_to_hbm [thread:$0]  %s167_s28, 128, %s169_s4, [#allocation3]  }
 0x1d4   :  { %245 = dma.done.wait [#allocation3], 128  }
 0x1d5   :  { %246 = vsyncadd [#allocation3], 4294967168 }
 0x1d6   :  { %176 = vsyncpa [#allocation3], 1 }

</bundles_post_ra>
